<compile_context>
chip_gen: v5e
topology: v5e:2x2
jax: 0.10.0
libtpu: 0.0.40
codegen_flags: <defaults>
</compile_context>

<pallas_src>
import functools

import jax
import jax.numpy as jnp
from jax.experimental import pallas as pl
from jax.experimental.pallas import tpu as pltpu


def _round_up(n, m):
    return ((n + m - 1) // m) * m


def _disc_kernel(xT_ref, w1_ref, w2_ref, aux_ref, b3_ref, out_ref, *, bf16_tanh):
    # xT_ref : (D, block_b)   -- batch on lanes
    # w1_ref : (H, D)
    # w2_ref : (H, H)
    # aux_ref: (H, 3)         -- columns: b1 | b2 | fc3 weight column
    # b3_ref : (1, 1) in SMEM
    hp = jax.lax.Precision.HIGHEST
    act_dt = jnp.bfloat16 if bf16_tanh else jnp.float32

    xT = xT_ref[...]
    b1 = aux_ref[:, 0:1]
    b2 = aux_ref[:, 1:2]
    w3c = aux_ref[:, 2:3]

    # fc1 + tanh : (H, block_b)
    pre1 = jnp.dot(w1_ref[...], xT, precision=hp,
                   preferred_element_type=jnp.float32) + b1
    h1 = jnp.tanh(pre1.astype(act_dt)).astype(jnp.float32)

    # fc2 + tanh : (H, block_b)
    pre2 = jnp.dot(w2_ref[...], h1, precision=hp,
                   preferred_element_type=jnp.float32) + b2
    h2 = jnp.tanh(pre2.astype(act_dt)).astype(jnp.float32)

    # fc3: single output row -> VPU multiply + sublane (XLU) reduce; keeps the
    # MXU free and the result already lane-dense.  b3 is a scalar from SMEM.
    logits = jnp.sum(w3c * h2, axis=0, keepdims=True) + b3_ref[0, 0]
    out_ref[...] = jax.nn.sigmoid(logits).astype(out_ref.dtype)


@functools.partial(jax.jit, static_argnames=("block_b", "bf16_tanh"))
def discriminator_forward(x_fm, w1, b1, w2, b2, w3, b3, *,
                          block_b=None, bf16_tanh=False):
    """Forward pass of the Discriminator (feature-major input).

    x_fm: (num_inputs, B) float32   -- feature-major (batch on last axis)
    w1  : (H, num_inputs), b1: (H,) -- PyTorch-native nn.Linear layouts
    w2  : (H, H),          b2: (H,)
    w3  : (1, H),          b3: (1,)
    Returns (B, 1) float32 probabilities.
    """
    D, B = x_fm.shape
    H = w1.shape[0]

    if block_b is None:
        if B <= 256:
            # One 128-lane tile per step: full vreg width / unmasked stores
            # without padding small batches out to 256.
            block_b = 128
        else:
            # Target >= 4 grid steps (balanced across v7x's two TensorCores),
            # tile capped at 1024 lanes; per-step footprint < 2 MB so VMEM is
            # never the limit on any generation.
            block_b = int(min(1024, _round_up(pl.cdiv(B, 4), 128)))

    B_pad = _round_up(B, block_b)
    if B_pad != B:
        # Only the ragged tail is padded; when B is already a multiple of
        # block_b there is no extra HBM pass over the input.
        x_fm = jnp.pad(x_fm, ((0, 0), (0, B_pad - B)))

    # Pack the three (H,) columns into a single small VMEM operand.
    aux = jnp.stack([b1, b2, w3.reshape(-1)], axis=1)   # (H, 3)
    b3s = b3.reshape(1, 1)

    kernel = functools.partial(_disc_kernel, bf16_tanh=bf16_tanh)

    out_t = pl.pallas_call(
        kernel,
        out_shape=jax.ShapeDtypeStruct((1, B_pad), jnp.float32),
        grid=(B_pad // block_b,),
        in_specs=[
            pl.BlockSpec((D, block_b), lambda i: (0, i)),       # x^T, lane tiles
            pl.BlockSpec((H, D), lambda i: (0, 0)),             # w1 (VMEM-resident)
            pl.BlockSpec((H, H), lambda i: (0, 0)),             # w2 (VMEM-resident)
            pl.BlockSpec((H, 3), lambda i: (0, 0)),             # packed b1|b2|w3
            pl.BlockSpec(memory_space=pltpu.MemorySpace.SMEM),  # b3 scalar
        ],
        out_specs=pl.BlockSpec((1, block_b), lambda i: (0, i)),
        compiler_params=pltpu.CompilerParams(
            dimension_semantics=("parallel",)
        ),
    )(x_fm, w1, w2, aux, b3s)

    return out_t[0, :B][:, None]


def discriminator_forward_bd(x, w1, b1, w2, b2, w3, b3, **kw):
    """Convenience wrapper taking PyTorch-native (B, num_inputs) input.

    Costs one extra HBM pass (the transpose to feature-major) before the
    kernel; prefer handing feature-major data to `discriminator_forward`.
    """
    return discriminator_forward(x.T, w1, b1, w2, b2, w3, b3, **kw)


def init_params(key, num_inputs, hidden_size):
    """Deterministic synthetic init mirroring the PyTorch module.

    Weights kept in PyTorch-native (out_features, in_features) form.
    fc3 weight scaled by 0.1 and bias zeroed, as in Discriminator.__init__.
    """
    k1, k2, k3 = jax.random.split(key, 3)

    def linear_init(k, fan_in, fan_out):
        # Matches torch.nn.Linear default: U(-1/sqrt(fan_in), 1/sqrt(fan_in))
        bound = 1.0 / jnp.sqrt(jnp.float32(fan_in))
        kw, kb = jax.random.split(k)
        w = jax.random.uniform(kw, (fan_out, fan_in), jnp.float32, -bound, bound)
        b = jax.random.uniform(kb, (fan_out,), jnp.float32, -bound, bound)
        return w, b

    w1, b1 = linear_init(k1, num_inputs, hidden_size)
    w2, b2 = linear_init(k2, hidden_size, hidden_size)
    w3, b3 = linear_init(k3, hidden_size, 1)
    w3 = w3 * 0.1
    b3 = b3 * 0.0
    return w1, b1, w2, b2, w3, b3


def reference_forward(x, w1, b1, w2, b2, w3, b3):
    hp = jax.lax.Precision.HIGHEST
    h1 = jnp.tanh(jnp.dot(x, w1.T, precision=hp) + b1)
    h2 = jnp.tanh(jnp.dot(h1, w2.T, precision=hp) + b2)
    return jax.nn.sigmoid(jnp.dot(h2, w3.T, precision=hp) + b3)


if __name__ == "__main__":
    key = jax.random.PRNGKey(0)
    kx, kp = jax.random.split(key)

    batch = 16
    num_inputs = 24   # e.g. state_dim + action_dim
    hidden_size = 32

    x = jax.random.normal(kx, (batch, num_inputs), jnp.float32)
    params = init_params(kp, num_inputs, hidden_size)

    # Primary path: caller hands feature-major (num_inputs, B) data.
    prob = discriminator_forward(x.T, *params)
    prob = jax.block_until_ready(prob)

    # Convenience path: PyTorch-native (B, num_inputs) input.
    prob_bd = jax.block_until_ready(discriminator_forward_bd(x, *params))

    ref = reference_forward(x, *params)
    assert prob.shape == (batch, 1)
    assert jnp.allclose(prob, ref, atol=2e-5, rtol=1e-5), (
        float(jnp.max(jnp.abs(prob - ref)))
    )
    assert jnp.allclose(prob_bd, ref, atol=2e-5, rtol=1e-5), (
        float(jnp.max(jnp.abs(prob_bd - ref)))
    )

    print("KERNEL_OK")
</pallas_src>

<mosaic_0001>
module attributes {stable_mosaic.version = 11 : i64} {
  func.func @_disc_kernel(%arg0: i32, %arg1: memref<24x128xf32, #tpu.memory_space<vmem>>, %arg2: memref<32x24xf32, #tpu.memory_space<vmem>>, %arg3: memref<32x32xf32, #tpu.memory_space<vmem>>, %arg4: memref<32x3xf32, #tpu.memory_space<vmem>>, %arg5: memref<1x1xf32, #tpu.memory_space<smem>>, %arg6: memref<1x128xf32, #tpu.memory_space<vmem>>) attributes {dimension_semantics = [#tpu.dimension_semantics<parallel>], iteration_bounds = array<i64: 1>, scalar_prefetch = 0 : i64, scratch_operands = 0 : i64, tpu.core_type = #tpu.core_type<tc>, window_params = [{transform_indices = @transform_0, window_bounds = array<i64: 24, 128>}, {pipeline_mode = #tpu.pipeline_mode<synchronous>, transform_indices = @transform_1, window_bounds = array<i64: 32, 24>}, {pipeline_mode = #tpu.pipeline_mode<synchronous>, transform_indices = @transform_2, window_bounds = array<i64: 32, 32>}, {pipeline_mode = #tpu.pipeline_mode<synchronous>, transform_indices = @transform_3, window_bounds = array<i64: 32, 3>}, {transform_indices = @transform_4, window_bounds = array<i64: 1, 1>}, {transform_indices = @transform_5, window_bounds = array<i64: 1, 128>}]} {
    %c0 = arith.constant 0 : index
    %c0_0 = arith.constant 0 : index
    %0 = vector.load %arg1[%c0, %c0_0] : memref<24x128xf32, #tpu.memory_space<vmem>>, vector<24x128xf32>
    %c0_1 = arith.constant 0 : index
    %c0_2 = arith.constant 0 : index
    %1 = vector.load %arg4[%c0_1, %c0_2] : memref<32x3xf32, #tpu.memory_space<vmem>>, vector<32x1xf32>
    %c0_3 = arith.constant 0 : index
    %c1 = arith.constant 1 : index
    %2 = vector.load %arg4[%c0_3, %c1] : memref<32x3xf32, #tpu.memory_space<vmem>>, vector<32x1xf32>
    %c0_4 = arith.constant 0 : index
    %c2 = arith.constant 2 : index
    %3 = vector.load %arg4[%c0_4, %c2] : memref<32x3xf32, #tpu.memory_space<vmem>>, vector<32x1xf32>
    %c0_5 = arith.constant 0 : index
    %c0_6 = arith.constant 0 : index
    %4 = vector.load %arg2[%c0_5, %c0_6] : memref<32x24xf32, #tpu.memory_space<vmem>>, vector<32x24xf32>
    %cst = arith.constant dense<0.000000e+00> : vector<32x128xf32>
    %5 = tpu.matmul %4, %0, %cst {dimension_numbers = #tpu.dot_dimension_numbers<[1], [0], [0], [1], [0, 0, 1, 1], [], []>, precision = #tpu.contract_precision<fp32>} : vector<32x24xf32>, vector<24x128xf32>, vector<32x128xf32> -> vector<32x128xf32>
    %6 = vector.broadcast %1 : vector<32x1xf32> to vector<32x128xf32>
    %7 = arith.addf %5, %6 : vector<32x128xf32>
    %8 = math.tanh %7 : vector<32x128xf32>
    %c0_7 = arith.constant 0 : index
    %c0_8 = arith.constant 0 : index
    %9 = vector.load %arg3[%c0_7, %c0_8] : memref<32x32xf32, #tpu.memory_space<vmem>>, vector<32x32xf32>
    %cst_9 = arith.constant dense<0.000000e+00> : vector<32x128xf32>
    %10 = tpu.matmul %9, %8, %cst_9 {dimension_numbers = #tpu.dot_dimension_numbers<[1], [0], [0], [1], [0, 0, 1, 1], [], []>, precision = #tpu.contract_precision<fp32>} : vector<32x32xf32>, vector<32x128xf32>, vector<32x128xf32> -> vector<32x128xf32>
    %11 = vector.broadcast %2 : vector<32x1xf32> to vector<32x128xf32>
    %12 = arith.addf %10, %11 : vector<32x128xf32>
    %13 = math.tanh %12 : vector<32x128xf32>
    %14 = vector.broadcast %3 : vector<32x1xf32> to vector<32x128xf32>
    %15 = arith.mulf %14, %13 : vector<32x128xf32>
    %cst_10 = arith.constant dense<0.000000e+00> : vector<128xf32>
    %16 = vector.multi_reduction <add>, %15, %cst_10 [0] : vector<32x128xf32> to vector<128xf32>
    %17 = vector.shape_cast %16 : vector<128xf32> to vector<1x128xf32>
    %c0_11 = arith.constant 0 : index
    %c0_12 = arith.constant 0 : index
    %18 = memref.load %arg5[%c0_11, %c0_12] : memref<1x1xf32, #tpu.memory_space<smem>>
    %19 = vector.broadcast %18 : f32 to vector<1x128xf32>
    %20 = arith.addf %17, %19 : vector<1x128xf32>
    %21 = arith.negf %20 : vector<1x128xf32>
    %22 = math.exp %21 : vector<1x128xf32>
    %cst_13 = arith.constant 1.000000e+00 : f32
    %23 = vector.broadcast %cst_13 : f32 to vector<1x128xf32>
    %24 = arith.addf %23, %22 : vector<1x128xf32>
    %25 = arith.divf %23, %24 : vector<1x128xf32>
    %c0_14 = arith.constant 0 : index
    %c0_15 = arith.constant 0 : index
    %26 = vector.load %arg6[%c0_14, %c0_15] : memref<1x128xf32, #tpu.memory_space<vmem>>, vector<1x128xf32>
    tpu.vector_store %arg6[%c0_14, %c0_15], %25 {strides = array<i32>} : memref<1x128xf32, #tpu.memory_space<vmem>>, vector<1x128xf32>,
    return
  }
  func.func @transform_0(%arg0: i32) -> (i32, i32) {
    %c0_i32 = arith.constant 0 : i32
    %c0_i32_0 = arith.constant 0 : i32
    return %c0_i32, %arg0 : i32, i32
  }
  func.func @transform_1(%arg0: i32) -> (i32, i32) {
    %c0_i32 = arith.constant 0 : i32
    %c0_i32_0 = arith.constant 0 : i32
    %c0_i32_1 = arith.constant 0 : i32
    return %c0_i32, %c0_i32_0 : i32, i32
  }
  func.func @transform_2(%arg0: i32) -> (i32, i32) {
    %c0_i32 = arith.constant 0 : i32
    %c0_i32_0 = arith.constant 0 : i32
    %c0_i32_1 = arith.constant 0 : i32
    return %c0_i32, %c0_i32_0 : i32, i32
  }
  func.func @transform_3(%arg0: i32) -> (i32, i32) {
    %c0_i32 = arith.constant 0 : i32
    %c0_i32_0 = arith.constant 0 : i32
    %c0_i32_1 = arith.constant 0 : i32
    return %c0_i32, %c0_i32_0 : i32, i32
  }
  func.func @transform_4(%arg0: i32) -> (i32, i32) {
    %c0_i32 = arith.constant 0 : i32
    %c0_i32_0 = arith.constant 0 : i32
    %c0_i32_1 = arith.constant 0 : i32
    return %c0_i32, %c0_i32_0 : i32, i32
  }
  func.func @transform_5(%arg0: i32) -> (i32, i32) {
    %c0_i32 = arith.constant 0 : i32
    %c0_i32_0 = arith.constant 0 : i32
    return %c0_i32, %arg0 : i32, i32
  }
}

</mosaic_0001>

<bundles_post_ra>
// kernel: discriminator_forward.1
= control target key start
LH: loop header
LB: loop body
LE: loop exit
PB: predicated region body
PF: predicated region fallthrough
CT: control target
= control target key end

     0   :  { %vm52_vm0 = vcmask 195584   ;;  %v737_v3 = vmov 0   ;;  %vm354_vm1 = vcmask 261120   ;;  %s915_s0 = inlined_call_operand.vmem [shape: f32[24,128], index: 0, kind: input, shape index: {}]   ;;  %s916_s1 = inlined_call_operand.vmem [shape: f32[32,24], index: 1, kind: input, shape index: {}]   ;;  %s917_s3 = inlined_call_operand.vmem [shape: f32[32,3], index: 3, kind: input, shape index: {}]   ;;  %s918_s2 = inlined_call_operand.vmem [shape: f32[32,32], index: 2, kind: input, shape index: {}]   ;;  %s919_s4 = inlined_call_operand.<no memory space> [shape: f32[1,1], index: 4, kind: input, shape index: {}]   ;;  %s920_s5 = inlined_call_operand.vmem [shape: f32[1,128], index: 5, kind: output, shape index: {}]  }
   0x1   :  { %v23_v0 = vld [vmem:[%s915_s0 + $0x10] sm:$0xff]  ;;  %v22_v1 = vld [vmem:[%s915_s0 + $0x8] sm:$0xff]  ;;  %v21_v2 = vld [vmem:[%s915_s0] sm:$0xff]  ;;  %710 = vset.pattern.permute.xlu1 %v737_v3  ;;  %709 = vset.pattern.permute.xlu0 %v737_v3 }
   0x2   :  { %v779_v4 = vand.u32 4294901760, %v23_v0  ;;  %v781_v5 = vand.u32 4294901760, %v22_v1  ;;  %v783_v6 = vand.u32 4294901760, %v21_v2  ;;  %v28_v7 = vld [vmem:[%s916_s1] sm:$0xff]  ;;  %v791_v8 = vld [vmem:[%s917_s3 + $0x8] sm:$0xff]  ;;  %v30_v12 = vld [vmem:[%s916_s1 + $0x10] sm:$0xff] }
   0x3   :  { %v29_v9 = vld [vmem:[%s916_s1 + $0x8] sm:$0xff]  ;;  %v54_v10 = vsel %vm52_vm0, %v28_v7, 0  ;;  %39 = vperm.xlu1 %710, %v791_v8   ;;  %v805_v13 = vld [vmem:[%s917_s3 + $0x18] sm:$0xff]  ;;  %v60_v19 = vsel %vm52_vm0, %v30_v12, 0  ;;  %v826_v29 = vld [vmem:[%s917_s3] sm:$0xff] }
   0x4   :  { %v57_v11 = vsel %vm52_vm0, %v29_v9, 0  ;;  %79 = vmatpush.msra.mxu0 %v779_v4  ;;  %v131_v14 = vsub.f32 %v23_v0, %v779_v4  ;;  %v137_v15 = vsub.f32 %v22_v1, %v781_v5  ;;  %222 = vmatpush.msra.mxu3 %v779_v4  ;;  %v143_v16 = vsub.f32 %v21_v2, %v783_v6  ;;  %v832_v35 = vld [vmem:[%s917_s3 + $0x10] sm:$0xff]  ;;  %v31_v38 = vld [vmem:[%s916_s1 + $0x18] sm:$0xff] }
   0x5   :  { %v812_v17 = vand.u32 4294901760, %v54_v10  ;;  %v814_v18 = vand.u32 4294901760, %v57_v11  ;;  %49 = vperm.xlu0 %709, %v805_v13   ;;  %v100_v30 = vand.u32 4294901760, %v60_v19  ;;  %v63_v41 = vsel %vm52_vm0, %v31_v38, 0  ;;  %v334_v38 = vld [vmem:[%s918_s2] sm:$0xff] }
   0x6   :  { %180 = vmatpush.msra.mxu2 %v131_v14  ;;  %81 = vmatpush.msra.mxu0 %v781_v5  ;;  %v132_v20 = vand.u32 4294901760, %v131_v14  ;;  %v138_v22 = vand.u32 4294901760, %v137_v15  ;;  %v144_v23 = vand.u32 4294901760, %v143_v16  ;;  %v108_v44 = vand.u32 4294901760, %v63_v41 }
   0x7   :  { %v85_v21 = vsub.f32 %v54_v10, %v812_v17  ;;  %224 = vmatpush.msra.mxu3 %v781_v5  ;;  %v93_v24 = vsub.f32 %v57_v11, %v814_v18  ;;  %v101_v40 = vsub.f32 %v60_v19, %v100_v30 }
   0x8   :  { %183 = vmatpush.msra.mxu2 %v137_v15  ;;  %83 = vmatpush.msra.mxu0 %v783_v6  ;;  %v133_v25 = vsub.f32 %v131_v14, %v132_v20  ;;  %v139_v27 = vsub.f32 %v137_v15, %v138_v22  ;;  %v145_v28 = vsub.f32 %v143_v16, %v144_v23 }
   0x9   :  { %v86_v26 = vand.u32 4294901760, %v85_v21  ;;  %226 = vmatpush.msra.mxu3 %v783_v6  ;;  %v94_v34 = vand.u32 4294901760, %v93_v24  ;;  %v102_v43 = vand.u32 4294901760, %v101_v40  ;;  %v109_v46 = vsub.f32 %v63_v41, %v108_v44 }
   0xa   :  { %268 = vmatpush.msrb.mxu0 %v132_v20  ;;  %v134_v31 = vand.u32 4294901760, %v133_v25  ;;  %186 = vmatpush.msra.mxu2 %v143_v16  ;;  %v140_v33 = vand.u32 4294901760, %v139_v27  ;;  %v146_v37 = vand.u32 4294901760, %v145_v28  ;;  %v356_v41 = vsel %vm354_vm1, %v334_v38, 0 }
   0xb   :  { %v87_v32 = vsub.f32 %v85_v21, %v86_v26  ;;  %230 = vmatmul.f32.vlgmr.msra.gmra.mxu3 %v86_v26  ;;  %189 = vmatmul.f32.vlgmr.msra.gmra.mxu2 %v85_v21  ;;  %v95_v39 = vsub.f32 %v93_v24, %v94_v34  ;;  %v103_v45 = vsub.f32 %v101_v40, %v102_v43  ;;  %v110_v48 = vand.u32 4294901760, %v109_v46 }
   0xc   :  { %34 = vperm.xlu1 %710, %v826_v29   ;;  %135 = vmatpush.msra.mxu1 %v134_v31 }
   0xd   :  { %v88_v36 = vand.u32 4294901760, %v87_v32  ;;  %272 = vmatpush.msrb.mxu0 %v138_v22  ;;  %44 = vperm.xlu0 %709, %v832_v35   ;;  %v96_v42 = vand.u32 4294901760, %v95_v39  ;;  %v104_v47 = vand.u32 4294901760, %v103_v45  ;;  %v111_v49 = vsub.f32 %v109_v46, %v110_v48 }
   0xe   :  { %141 = vmatpush.msra.mxu1 %v140_v33 }
   0xf   :  { %89 = vmatmul.f32.vlgmr.msra.gmra.mxu0 %v88_v36  ;;  %v112_v50 = vand.u32 4294901760, %v111_v49  ;;  %v335_v49 = vld [vmem:[%s918_s2 + $0x8] sm:$0xff] }
  0x10   :  { %276 = vmatpush.msrb.mxu0 %v144_v23  ;;  %147 = vmatpush.msra.mxu1 %v146_v37 }
  0x11   :  { %149 = vmatmul.f32.vlgmr.msra.gmra.mxu1 %v812_v17 }
  0x12   :  { %308 = vmatpush.msrb.mxu1 %v779_v4 }
  0x13   :  { %236 = vmatmul.f32.gmra.mxu3 %v94_v34  ;;  %194 = vmatmul.f32.gmra.mxu2 %v93_v24 }
  0x14   :  { %310 = vmatpush.msrb.mxu1 %v781_v5 }
  0x16   :  { %312 = vmatpush.msrb.mxu1 %v783_v6 }
  0x17   :  { %97 = vmatmul.f32.gmra.mxu0 %v96_v42 }
  0x19   :  { %153 = vmatmul.f32.gmra.mxu1 %v814_v18 }
  0x1b   :  { %242 = vmatmul.f32.gmra.mxu3 %v102_v43  ;;  %199 = vmatmul.f32.gmra.mxu2 %v101_v40 }
  0x1f   :  { %105 = vmatmul.f32.gmra.mxu0 %v104_v47 }
  0x21   :  { %157 = vmatmul.f32.gmra.mxu1 %v100_v30 }
  0x23   :  { %248 = vmatmul.f32.gmra.mxu3 %v110_v48  ;;  %204 = vmatmul.f32.gmra.mxu2 %v109_v46  ;;  %v853_v46 = vand.u32 4294901760, %v356_v41 }
  0x27   :  { %113 = vmatmul.f32.gmra.mxu0 %v112_v50 }
  0x29   :  { %161 = vmatmul.f32.gmra.mxu1 %v108_v44 }
  0x2f   :  { %278 = vmatmul.f32.vlgmr.msrb.gmra.mxu0 %v812_v17 }
  0x31   :  { %314 = vmatmul.f32.vlgmr.msrb.gmra.mxu1 %v812_v17 }
  0x37   :  { %282 = vmatmul.f32.gmra.mxu0 %v814_v18 }
  0x39   :  { %318 = vmatmul.f32.gmra.mxu1 %v814_v18 }
  0x3f   :  { %286 = vmatmul.f32.gmra.mxu0 %v100_v30 }
  0x41   :  { %322 = vmatmul.f32.gmra.mxu1 %v100_v30 }
  0x47   :  { %290 = vmatmul.f32.gmra.mxu0 %v108_v44 }
  0x49   :  { %326 = vmatmul.f32.gmra.mxu1 %v108_v44 }
  0x75   :  { %v40_v61 = vpop.permute.xlu1 %39 }
  0x77   :  { %v50_v59 = vpop.permute.xlu0 %49 }
  0x7e   :  { %v35_v3 = vpop.permute.xlu1 %34 }
  0x7f   :  { %v45_v2 = vpop.permute.xlu0 %44 }
  0x8c   :  { %v90_v51 = vpop.f32.mrf.mxu0 }
  0x8d   :  { %v91_v7 = vadd.f32 %v90_v51, %v35_v3  ;;  %v388_v51 = vsub.f32 %v356_v41, %v853_v46 }
  0x8e   :  { %v150_v52 = vpop.f32.mrf.mxu1  ;;  %v190_v56 = vpop.f32.mrf.mxu2 }
  0x8f   :  { %v231_v58 = vpop.f32.mrf.mxu3  ;;  %v151_v14 = vadd.f32 %v150_v52, %v91_v7 }
  0x91   :  { %v191_v20 = vadd.f32 %v190_v56, %v151_v14 }
  0x93   :  { %v232_v26 = vadd.f32 %v231_v58, %v191_v20 }
  0x94   :  { %v98_v53 = vpop.f32.mrf.mxu0 }
  0x95   :  { %v99_v5 = vadd.f32 %v98_v53, %v40_v61  ;;  %v359_v53 = vsel %vm354_vm1, %v335_v49, 0 }
  0x96   :  { %v154_v54 = vpop.f32.mrf.mxu1  ;;  %v195_v63 = vpop.f32.mrf.mxu2 }
  0x97   :  { %v237_v1 = vpop.f32.mrf.mxu3  ;;  %v155_v10 = vadd.f32 %v154_v54, %v99_v5 }
  0x99   :  { %v196_v17 = vadd.f32 %v195_v63, %v155_v10 }
  0x9b   :  { %v238_v21 = vadd.f32 %v237_v1, %v196_v17 }
  0x9c   :  { %v106_v55 = vpop.f32.mrf.mxu0 }
  0x9d   :  { %v107_v6 = vadd.f32 %v106_v55, %v45_v2 }
  0x9e   :  { %v158_v57 = vpop.f32.mrf.mxu1  ;;  %v200_v9 = vpop.f32.mrf.mxu2 }
  0x9f   :  { %v159_v11 = vadd.f32 %v158_v57, %v107_v6  ;;  %v243_v15 = vpop.f32.mrf.mxu3  ;;  %v389_v57 = vand.u32 4294901760, %v388_v51 }
  0xa1   :  { %v201_v18 = vadd.f32 %v200_v9, %v159_v11  ;;  %v390_v1 = vsub.f32 %v388_v51, %v389_v57 }
  0xa3   :  { %v244_v22 = vadd.f32 %v243_v15, %v201_v18  ;;  %v391_v10 = vand.u32 4294901760, %v390_v1  ;;  %v337_v18 = vld [vmem:[%s918_s2 + $0x18] sm:$0xff] }
  0xa4   :  { %v114_v60 = vpop.f32.mrf.mxu0 }
  0xa5   :  { %v115_v19 = vadd.f32 %v114_v60, %v50_v59  ;;  %v868_v60 = vand.u32 4294901760, %v359_v53 }
  0xa6   :  { %v162_v62 = vpop.f32.mrf.mxu1  ;;  %v205_v25 = vpop.f32.mrf.mxu2 }
  0xa7   :  { %v163_v23 = vadd.f32 %v162_v62, %v115_v19  ;;  %v249_v36 = vpop.f32.mrf.mxu3 }
  0xa9   :  { %v206_v31 = vadd.f32 %v205_v25, %v163_v23 }
  0xab   :  { %v250_v39 = vadd.f32 %v249_v36, %v206_v31  ;;  %v739_v36 = vmov 2  }
  0xac   :  { %v279_v0 = vpop.f32.mrf.mxu0 }
  0xad   :  { %v280_v32 = vadd.f32 %v279_v0, %v232_v26  ;;  %v336_v0 = vld [vmem:[%s918_s2 + $0x10] sm:$0xff] }
  0xae   :  { %v315_v4 = vpop.f32.mrf.mxu1  ;;  %v362_v5 = vsel %vm354_vm1, %v336_v0, 0 }
  0xaf   :  { %v316_v37 = vadd.f32 %v315_v4, %v280_v32  ;;  %v396_v4 = vsub.f32 %v359_v53, %v868_v60  ;;  %v881_v15 = vand.u32 4294901760, %v362_v5 }
  0xb1   :  { %v397_v14 = vand.u32 4294901760, %v396_v4 }
  0xb3   :  { %v398_v20 = vsub.f32 %v396_v4, %v397_v14 }
  0xb4   :  { %v283_v12 = vpop.f32.mrf.mxu0 }
  0xb5   :  { %v284_v27 = vadd.f32 %v283_v12, %v238_v21  ;;  %v404_v21 = vsub.f32 %v362_v5, %v881_v15 }
  0xb6   :  { %v319_v16 = vpop.f32.mrf.mxu1 }
  0xb7   :  { %v320_v33 = vadd.f32 %v319_v16, %v284_v27  ;;  %v405_v25 = vand.u32 4294901760, %v404_v21  ;;  %v738_v27 = vmov 1  }
  0xb8   :  { %712 = vset.pattern.permute.xlu0 %v738_v27  ;;  %713 = vset.pattern.permute.xlu1 %v738_v27 }
  0xb9   :  { %347 = vperm.xlu0 %712, %v832_v35   ;;  %351 = vperm.xlu1 %713, %v805_v13  }
  0xba   :  { %711 = vset.pattern.permute.xlu2 %v738_v27 }
  0xbb   :  { %339 = vperm.xlu2 %711, %v826_v29  }
  0xbc   :  { %v287_v24 = vpop.f32.mrf.mxu0 }
  0xbd   :  { %v288_v28 = vadd.f32 %v287_v24, %v244_v22  ;;  %v365_v22 = vsel %vm354_vm1, %v337_v18, 0  ;;  %v399_v24 = vand.u32 4294901760, %v398_v20 }
  0xbe   :  { %v323_v30 = vpop.f32.mrf.mxu1  ;;  %v411_v26 = vand.u32 4294901760, %v365_v22 }
  0xbf   :  { %v324_v34 = vadd.f32 %v323_v30, %v288_v28  ;;  %v406_v28 = vsub.f32 %v404_v21, %v405_v25 }
  0xc0   :  { %v412_v30 = vsub.f32 %v365_v22, %v411_v26 }
  0xc1   :  { %717 = vtanh.f32 %v324_v34  ;;  %v407_v31 = vand.u32 4294901760, %v406_v28  ;;  %715 = vset.pattern.permute.xlu1 %v739_v36  ;;  %716 = vset.pattern.permute.xlu0 %v739_v36 }
  0xc2   :  { %719 = vtanh.f32 %v320_v33  ;;  %v413_v32 = vand.u32 4294901760, %v412_v30  ;;  %654 = vperm.xlu1 %715, %v791_v8   ;;  %662 = vperm.xlu0 %716, %v805_v13  }
  0xc3   :  { %721 = vtanh.f32 %v316_v37  ;;  %343 = vperm.xlu2 %711, %v791_v8  }
  0xc4   :  { %v291_v40 = vpop.f32.mrf.mxu0  ;;  %v414_v33 = vsub.f32 %v412_v30, %v413_v32 }
  0xc5   :  { %v292_v42 = vadd.f32 %v291_v40, %v250_v39 }
  0xc6   :  { %v327_v43 = vpop.f32.mrf.mxu1  ;;  %v415_v34 = vand.u32 4294901760, %v414_v33 }
  0xc7   :  { %v718_v44 = vpop.eup %717  ;;  %v328_v45 = vadd.f32 %v327_v43, %v292_v42 }
  0xc8   :  { %v720_v47 = vpop.eup %719  ;;  %v855_v48 = vand.u32 4294901760, %v718_v44 }
  0xc9   :  { %723 = vtanh.f32 %v328_v45  ;;  %v722_v50 = vpop.eup %721  ;;  %v861_v52 = vand.u32 4294901760, %v720_v47 }
  0xca   :  { %v439_v54 = vsub.f32 %v718_v44, %v855_v48  ;;  %v865_v55 = vand.u32 4294901760, %v722_v50 }
  0xcb   :  { %v445_v59 = vsub.f32 %v720_v47, %v861_v52  ;;  %714 = vset.pattern.permute.xlu2 %v739_v36 }
  0xcc   :  { %v451_v62 = vsub.f32 %v722_v50, %v865_v55  ;;  %v440_v63 = vand.u32 4294901760, %v439_v54  ;;  %650 = vperm.xlu2 %714, %v826_v29  }
  0xcd   :  { %v446_v3 = vand.u32 4294901760, %v445_v59 }
  0xce   :  { %v441_v7 = vsub.f32 %v439_v54, %v440_v63  ;;  %v452_v9 = vand.u32 4294901760, %v451_v62 }
  0xcf   :  { %v724_v56 = vpop.eup %723  ;;  %v447_v12 = vsub.f32 %v445_v59, %v446_v3 }
  0xd0   :  { %v379_v58 = vand.u32 4294901760, %v724_v56  ;;  %v442_v16 = vand.u32 4294901760, %v441_v7  ;;  %v453_v17 = vsub.f32 %v451_v62, %v452_v9 }
  0xd1   :  { %v448_v19 = vand.u32 4294901760, %v447_v12 }
  0xd2   :  { %380 = vmatpush.msrb.mxu2 %v379_v58  ;;  %531 = vmatpush.msra.mxu1 %v379_v58  ;;  %v433_v61 = vsub.f32 %v724_v56, %v379_v58  ;;  %v454_v23 = vand.u32 4294901760, %v453_v17 }
  0xd4   :  { %382 = vmatpush.msrb.mxu2 %v855_v48  ;;  %487 = vmatpush.msra.mxu0 %v433_v61  ;;  %v434_v2 = vand.u32 4294901760, %v433_v61 }
  0xd5   :  { %533 = vmatpush.msra.mxu1 %v855_v48  ;;  %658 = vperm.xlu2 %714, %v832_v35  }
  0xd6   :  { %384 = vmatpush.msrb.mxu2 %v861_v52  ;;  %490 = vmatpush.msra.mxu0 %v439_v54  ;;  %v435_v6 = vsub.f32 %v433_v61, %v434_v2 }
  0xd7   :  { %535 = vmatpush.msra.mxu1 %v861_v52 }
  0xd8   :  { %386 = vmatpush.msrb.mxu2 %v865_v55  ;;  %493 = vmatpush.msra.mxu0 %v445_v59  ;;  %v436_v11 = vand.u32 4294901760, %v435_v6 }
  0xd9   :  { %537 = vmatpush.msra.mxu1 %v865_v55  ;;  %392 = vmatmul.f32.vlgmr.msrb.gmra.mxu2 %v391_v10 }
  0xda   :  { %578 = vmatpush.msra.mxu2 %v434_v2  ;;  %437 = vmatpush.msrb.mxu3 %v436_v11 }
  0xdb   :  { %496 = vmatpush.msra.mxu0 %v451_v62  ;;  %541 = vmatmul.f32.vlgmr.msra.gmra.mxu1 %v389_v57 }
  0xdc   :  { %582 = vmatpush.msra.mxu2 %v440_v63  ;;  %499 = vmatmul.f32.vlgmr.msra.gmra.mxu0 %v388_v51 }
  0xdd   :  { %443 = vmatpush.msrb.mxu3 %v442_v16 }
  0xde   :  { %586 = vmatpush.msra.mxu2 %v446_v3 }
  0xdf   :  { %449 = vmatpush.msrb.mxu3 %v448_v19 }
  0xe0   :  { %590 = vmatpush.msra.mxu2 %v452_v9 }
  0xe1   :  { %455 = vmatpush.msrb.mxu3 %v454_v23  ;;  %400 = vmatmul.f32.gmra.mxu2 %v399_v24 }
  0xe2   :  { %457 = vmatmul.f32.vlgmr.msrb.gmra.mxu3 %v853_v46 }
  0xe3   :  { %621 = vmatpush.msra.mxu3 %v379_v58  ;;  %547 = vmatmul.f32.gmra.mxu1 %v397_v14 }
  0xe4   :  { %504 = vmatmul.f32.gmra.mxu0 %v396_v4 }
  0xe5   :  { %623 = vmatpush.msra.mxu3 %v855_v48 }
  0xe7   :  { %625 = vmatpush.msra.mxu3 %v861_v52 }
  0xe9   :  { %627 = vmatpush.msra.mxu3 %v865_v55  ;;  %408 = vmatmul.f32.gmra.mxu2 %v407_v31 }
  0xea   :  { %461 = vmatmul.f32.gmra.mxu3 %v868_v60 }
  0xeb   :  { %553 = vmatmul.f32.gmra.mxu1 %v405_v25 }
  0xec   :  { %509 = vmatmul.f32.gmra.mxu0 %v404_v21 }
  0xf1   :  { %416 = vmatmul.f32.gmra.mxu2 %v415_v34 }
  0xf2   :  { %465 = vmatmul.f32.gmra.mxu3 %v881_v15 }
  0xf3   :  { %559 = vmatmul.f32.gmra.mxu1 %v413_v32 }
  0xf4   :  { %514 = vmatmul.f32.gmra.mxu0 %v412_v30 }
  0xf9   :  { %592 = vmatmul.f32.vlgmr.msra.gmra.mxu2 %v853_v46 }
  0xfa   :  { %469 = vmatmul.f32.gmra.mxu3 %v411_v26 }
 0x101   :  { %596 = vmatmul.f32.gmra.mxu2 %v868_v60 }
 0x102   :  { %629 = vmatmul.f32.vlgmr.msra.gmra.mxu3 %v853_v46 }
 0x109   :  { %600 = vmatmul.f32.gmra.mxu2 %v881_v15 }
 0x10a   :  { %633 = vmatmul.f32.gmra.mxu3 %v868_v60 }
 0x111   :  { %604 = vmatmul.f32.gmra.mxu2 %v411_v26 }
 0x112   :  { %637 = vmatmul.f32.gmra.mxu3 %v881_v15 }
 0x115   :  { %v340_v41 = vpop.permute.xlu2 %339 }
 0x11a   :  { %641 = vmatmul.f32.gmra.mxu3 %v411_v26 }
 0x11d   :  { %v344_v46 = vpop.permute.xlu2 %343 }
 0x126   :  { %v651_v19 = vpop.permute.xlu2 %650 }
 0x12b   :  { %v348_v48 = vpop.permute.xlu0 %347  ;;  %v352_v58 = vpop.permute.xlu1 %351 }
 0x12f   :  { %v659_v30 = vpop.permute.xlu2 %658 }
 0x134   :  { %v655_v24 = vpop.permute.xlu1 %654  ;;  %v663_v33 = vpop.permute.xlu0 %662 }
 0x158   :  { %v542_v43 = vpop.f32.mrf.mxu1 }
 0x159   :  { %v500_v40 = vpop.f32.mrf.mxu0 }
 0x15c   :  { %v393_v8 = vpop.f32.mrf.mxu2 }
 0x15d   :  { %v394_v50 = vadd.f32 %v393_v8, %v340_v41 }
 0x160   :  { %v548_v47 = vpop.f32.mrf.mxu1 }
 0x161   :  { %v505_v35 = vpop.f32.mrf.mxu0 }
 0x164   :  { %v401_v37 = vpop.f32.mrf.mxu2 }
 0x165   :  { %v458_v13 = vpop.f32.mrf.mxu3  ;;  %v402_v49 = vadd.f32 %v401_v37, %v344_v46 }
 0x166   :  { %v459_v55 = vadd.f32 %v458_v13, %v394_v50 }
 0x168   :  { %v501_v60 = vadd.f32 %v500_v40, %v459_v55  ;;  %v554_v62 = vpop.f32.mrf.mxu1 }
 0x169   :  { %v510_v56 = vpop.f32.mrf.mxu0 }
 0x16a   :  { %v543_v3 = vadd.f32 %v542_v43, %v501_v60 }
 0x16c   :  { %v409_v39 = vpop.f32.mrf.mxu2 }
 0x16d   :  { %v462_v38 = vpop.f32.mrf.mxu3  ;;  %v410_v52 = vadd.f32 %v409_v39, %v348_v48 }
 0x16e   :  { %v463_v53 = vadd.f32 %v462_v38, %v402_v49 }
 0x170   :  { %v506_v59 = vadd.f32 %v505_v35, %v463_v53  ;;  %v560_v17 = vpop.f32.mrf.mxu1 }
 0x171   :  { %v515_v9 = vpop.f32.mrf.mxu0 }
 0x172   :  { %v549_v1 = vadd.f32 %v548_v47, %v506_v59 }
 0x174   :  { %v417_v42 = vpop.f32.mrf.mxu2 }
 0x175   :  { %v466_v29 = vpop.f32.mrf.mxu3  ;;  %v418_v63 = vadd.f32 %v417_v42, %v352_v58  ;;  %v679_v42 = vstv %s919_s4 }
 0x176   :  { %v467_v57 = vadd.f32 %v466_v29, %v410_v52 }
 0x178   :  { %v511_v0 = vadd.f32 %v510_v56, %v467_v57 }
 0x17a   :  { %v555_v5 = vadd.f32 %v554_v62, %v511_v0 }
 0x17c   :  { %v593_v45 = vpop.f32.mrf.mxu2 }
 0x17d   :  { %v470_v44 = vpop.f32.mrf.mxu3  ;;  %v594_v7 = vadd.f32 %v593_v45, %v543_v3 }
 0x17e   :  { %v471_v6 = vadd.f32 %v470_v44, %v418_v63 }
 0x180   :  { %v516_v16 = vadd.f32 %v515_v9, %v471_v6 }
 0x182   :  { %v561_v20 = vadd.f32 %v560_v17, %v516_v16 }
 0x184   :  { %v597_v54 = vpop.f32.mrf.mxu2 }
 0x185   :  { %v630_v51 = vpop.f32.mrf.mxu3  ;;  %v598_v4 = vadd.f32 %v597_v54, %v549_v1 }
 0x186   :  { %v631_v12 = vadd.f32 %v630_v51, %v594_v7 }
 0x18c   :  { %v601_v2 = vpop.f32.mrf.mxu2 }
 0x18d   :  { %v634_v61 = vpop.f32.mrf.mxu3  ;;  %v602_v11 = vadd.f32 %v601_v2, %v555_v5 }
 0x18e   :  { %v635_v10 = vadd.f32 %v634_v61, %v598_v4 }
 0x190   :  { %725 = vtanh.f32 %v635_v10 }
 0x191   :  { %727 = vtanh.f32 %v631_v12 }
 0x194   :  { %v605_v18 = vpop.f32.mrf.mxu2 }
 0x195   :  { %v638_v14 = vpop.f32.mrf.mxu3  ;;  %v606_v21 = vadd.f32 %v605_v18, %v561_v20 }
 0x196   :  { %v639_v15 = vadd.f32 %v638_v14, %v602_v11  ;;  %v726_v23 = vpop.eup %725 }
 0x197   :  { %v728_v26 = vpop.eup %727  ;;  %v666_v28 = vmul.f32 %v726_v23, %v655_v24 }
 0x198   :  { %729 = vtanh.f32 %v639_v15  ;;  %v665_v31 = vmul.f32 %v728_v26, %v651_v19 }
 0x19a   :  { %v669_v34 = vadd.f32 %v666_v28, %v665_v31 }
 0x19d   :  { %v642_v22 = vpop.f32.mrf.mxu3 }
 0x19e   :  { %v643_v25 = vadd.f32 %v642_v22, %v606_v21  ;;  %v730_v27 = vpop.eup %729 }
 0x19f   :  { %v667_v32 = vmul.f32 %v730_v27, %v659_v30 }
 0x1a0   :  { %731 = vtanh.f32 %v643_v25 }
 0x1a1   :  { %v670_v8 = vadd.f32 %v669_v34, %v667_v32 }
 0x1a6   :  { %v732_v36 = vpop.eup %731 }
 0x1a7   :  { %v668_v13 = vmul.f32 %v732_v36, %v663_v33 }
 0x1a9   :  { %v671_v37 = vadd.f32 %v670_v8, %v668_v13 }
 0x1ab   :  { %v672_v38 = vrot.slane %v671_v37, 4 }
 0x1ad   :  { %v673_v39 = vadd.f32 %v672_v38, %v671_v37 }
 0x1af   :  { %v674_v29 = vrot.slane %v673_v39, 2 }
 0x1b1   :  { %v675_v40 = vadd.f32 %v674_v29, %v673_v39 }
 0x1b3   :  { %v676_v41 = vrot.slane %v675_v40, 1 }
 0x1b5   :  { %v677_v43 = vadd.f32 %v676_v41, %v675_v40 }
 0x1b7   :  { %v680_v44 = vadd.f32 %v679_v42, %v677_v43 }
 0x1b9   :  { %v705_v35 = vmul.f32 -1.442695, %v680_v44 }
 0x1bb   :  { %733 = vpow2.f32 %v705_v35 }
 0x1c1   :  { %v734_v45 = vpop.eup %733 }
 0x1c2   :  { %v684_v46 = vadd.f32 1.0, %v734_v45 }
 0x1c4   :  { %735 = vrcp.f32 %v684_v46  ;;  %v696_v50 = vand.u32 2147483648, %v684_v46  ;;  %v694_v52 = vand.u32 2147483647, %v684_v46  ;;  %vm690_vm3 = vweird.f32 %v684_v46 }
 0x1c6   :  { %v697_v54 = vor.u32 1.1754944e-38, %v696_v50  ;;  %vm695_vm5 = vcmp.eq.f32.partialorder %v694_v52, 8.507059e+37 }
 0x1ca   :  { %v736_v47 = vpop.eup %735 }
 0x1cb   :  { %v686_v48 = vmul.f32 %v736_v47, %v684_v46  ;;  %vm691_vm2 = vweird.f32 %v736_v47 }
 0x1cc   :  { %vm692_vm4 = vmor %vm690_vm3, %vm691_vm2 }
 0x1cd   :  { %v687_v49 = vsub.f32 1.0, %v686_v48 }
 0x1cf   :  { %v688_v51 = vmul.f32 %v736_v47, %v687_v49 }
 0x1d1   :  { %v689_v53 = vadd.f32 %v736_v47, %v688_v51 }
 0x1d3   :  { %v693_v55 = vsel %vm692_vm4, %v736_v47, %v689_v53 }
 0x1d4   :  { %v698_v56 = vsel %vm695_vm5, %v697_v54, %v693_v55 }
 0x1d5   :  { %700 = vst [vmem:[%s920_s5] sm:$0x1] %v698_v56 }

</bundles_post_ra>
